<compile_context>
chip_gen: v7x
topology: tpu7x:2x2x1
jax: 0.10.0
libtpu: 0.0.40
codegen_flags: <defaults>
</compile_context>

<pallas_src>
import functools

import jax
import jax.numpy as jnp
from jax.experimental import pallas as pl
from jax.experimental.pallas import tpu as pltpu


# ---------------------------------------------------------------------------
# fused kernel: one (b_blk, C, HW) slab per grid step
# ---------------------------------------------------------------------------
def _cca_fused_kernel(x_ref, w1t_ref, b1_ref, w2t_ref, b2_ref, o_ref, *,
                      hw, chunk):
    b, c, _ = x_ref.shape
    inv_hw = 1.0 / float(hw)

    # Single-pass statistics, chunked over the lane (HW) axis: the f32
    # temporaries (cast + x*x) never exceed one chunk regardless of the input
    # dtype, so they are covered by the wrapper's VMEM accounting.
    # TODO(synk): move to Welford/merged-chunk accumulation if activations are
    # far from zero-centered (E[x^2] - mean^2 cancellation).
    s1 = jnp.zeros((b, c), jnp.float32)
    s2 = jnp.zeros((b, c), jnp.float32)
    for lo in range(0, hw, chunk):
        sz = min(chunk, hw - lo)
        xc = x_ref[:, :, lo:lo + sz].astype(jnp.float32)
        s1 = s1 + jnp.sum(xc, axis=-1)
        s2 = s2 + jnp.sum(xc * xc, axis=-1)

    mean = s1 * inv_hw
    var = jnp.maximum(s2 * inv_hw - mean * mean, 0.0)
    y = jnp.sqrt(var) + mean                                  # stdv + avg_pool

    # Gate MLP (the two 1x1 convs) as tiny batched matmuls; no MXU tuning —
    # the binding resource is HBM bandwidth on the x stream.
    z = jnp.dot(y, w1t_ref[...], preferred_element_type=jnp.float32) + b1_ref[...]
    z = jnp.maximum(z, 0.0)
    g = jax.nn.sigmoid(
        jnp.dot(z, w2t_ref[...], preferred_element_type=jnp.float32) + b2_ref[...])

    # Apply in the input dtype straight out of the BlockSpec buffer
    # (no full-slab f32 materialization; bf16 inputs stay bf16 on the store).
    g = g.astype(o_ref.dtype)
    o_ref[...] = x_ref[...] * g[:, :, None]


# ---------------------------------------------------------------------------
# two-pass kernels for slabs that do not fit VMEM (esp. v7x: 64 MiB / TC)
# ---------------------------------------------------------------------------
def _cca_stats_kernel(x_ref, s1_ref, s2_ref, *, hw, hw_tile):
    h = pl.program_id(1)

    @pl.when(h == 0)
    def _():
        s1_ref[...] = jnp.zeros_like(s1_ref)
        s2_ref[...] = jnp.zeros_like(s2_ref)

    x = x_ref[...].astype(jnp.float32)                        # (b, C, hw_tile)
    # Mask the ragged last HW tile (out-of-bounds lanes hold garbage).
    lane = jax.lax.broadcasted_iota(jnp.int32, x.shape, dimension=2)
    x = jnp.where(h * hw_tile + lane < hw, x, 0.0)

    s1_ref[...] += jnp.sum(x, axis=-1)[:, None, :]
    s2_ref[...] += jnp.sum(x * x, axis=-1)[:, None, :]


def _cca_apply_kernel(s1_ref, s2_ref, w1t_ref, b1_ref, w2t_ref, b2_ref,
                      x_ref, o_ref, g_ref, *, hw):
    @pl.when(pl.program_id(1) == 0)
    def _():
        inv_hw = 1.0 / float(hw)
        s1 = s1_ref[...][:, 0, :]                             # (b, C)
        s2 = s2_ref[...][:, 0, :]
        mean = s1 * inv_hw
        var = jnp.maximum(s2 * inv_hw - mean * mean, 0.0)
        y = jnp.sqrt(var) + mean
        z = jnp.dot(y, w1t_ref[...], preferred_element_type=jnp.float32) + b1_ref[...]
        z = jnp.maximum(z, 0.0)
        g_ref[...] = jax.nn.sigmoid(
            jnp.dot(z, w2t_ref[...], preferred_element_type=jnp.float32)
            + b2_ref[...])

    g = g_ref[...].astype(o_ref.dtype)
    o_ref[...] = x_ref[...] * g[:, :, None]


# ---------------------------------------------------------------------------
# wrapper
# ---------------------------------------------------------------------------
def _vmem_capacity_bytes():
    """Physical VMEM per TensorCore (v5e/v6e: 128 MiB, v7x: 64 MiB)."""
    try:
        cap = getattr(pltpu.get_tpu_info(), "vmem_capacity_bytes", None)
        if cap:
            return int(cap)
    except Exception:
        pass
    return 128 * 1024 * 1024


def cca_layer(x, w1, b1, w2, b2, *, vmem_budget_bytes=None,
              force_two_pass=False):
    """CCALayer forward.

    x : (N, C, H, W)
    w1: (C//r, C), b1: (C//r,)   -- first 1x1 conv (squeeze)
    w2: (C, C//r), b2: (C,)      -- second 1x1 conv (excite)
    """
    N, C, H, W = x.shape
    HW = H * W
    Cr = w1.shape[0]
    itemsize = jnp.dtype(x.dtype).itemsize

    # Lane-dense layout: spatial on lanes, channels on sublanes.
    x_flat = x.reshape(N, C, HW)

    # Pre-transpose the 1x1-conv weights once so in-kernel matmuls are
    # plain row-major (B,C)@(C,Cr) and (B,Cr)@(Cr,C).
    w1t = jnp.asarray(w1, jnp.float32).T                      # (C, Cr)
    w2t = jnp.asarray(w2, jnp.float32).T                      # (Cr, C)
    b1r = jnp.asarray(b1, jnp.float32).reshape(1, Cr)
    b2r = jnp.asarray(b2, jnp.float32).reshape(1, C)
    weight_bytes = 4 * int(w1t.size + w2t.size + b1r.size + b2r.size)

    # Generation-aware VMEM budget / limit (~80 MiB on 128 MiB chips, ~40 MiB
    # on v7x); limit capped at ~80% of capacity to leave compiler headroom.
    capacity = _vmem_capacity_bytes()
    if vmem_budget_bytes is None:
        vmem_budget_bytes = int(capacity * 5 // 8)
    limit_cap = max(int(capacity * 4 // 5), 16 << 20)
    headroom = 2 << 20

    # ---- fused-path VMEM accounting (per image) ---------------------------
    # 2x input + 2x output slabs (double-buffered) + 1 slab-sized apply
    # temporary + chunk-sized f32 stats temporaries + weights.
    chunk = min(HW, 1024)
    slab_bytes = C * HW * itemsize
    per_image = 5 * slab_bytes + 3 * C * chunk * 4
    fused_fits = (per_image + weight_bytes + headroom) <= vmem_budget_bytes

    if fused_fits and not force_two_pass:
        max_b = max(1, (vmem_budget_bytes - weight_bytes - headroom) // per_image)
        # Keep >= 2 grid steps whenever N >= 2 so the "parallel" batch axis
        # can shard across v7x's two TensorCores (harmless on v5e/v6e).
        b_cap = pl.cdiv(N, 2) if N >= 2 else 1
        b_blk = int(max(1, min(max_b, b_cap, N)))
        # Ragged last batch block is fine: per-image stats are independent and
        # out-of-bounds output stores are masked.
        grid = (pl.cdiv(N, b_blk),)
        vmem_limit = int(min(max(b_blk * per_image + weight_bytes + headroom,
                                 16 << 20), limit_cap))

        out_flat = pl.pallas_call(
            functools.partial(_cca_fused_kernel, hw=HW, chunk=chunk),
            out_shape=jax.ShapeDtypeStruct((N, C, HW), x.dtype),
            grid_spec=pltpu.PrefetchScalarGridSpec(
                num_scalar_prefetch=0,
                grid=grid,
                in_specs=[
                    # TODO(synk): add pipeline_mode=pl.Buffered(3) on x if
                    # profiling shows exposed input DMA on long grids.
                    pl.BlockSpec((b_blk, C, HW), lambda n: (n, 0, 0)),
                    pl.BlockSpec((C, Cr), lambda n: (0, 0)),
                    pl.BlockSpec((1, Cr), lambda n: (0, 0)),
                    pl.BlockSpec((Cr, C), lambda n: (0, 0)),
                    pl.BlockSpec((1, C), lambda n: (0, 0)),
                ],
                out_specs=pl.BlockSpec((b_blk, C, HW), lambda n: (n, 0, 0)),
            ),
            compiler_params=pltpu.CompilerParams(
                dimension_semantics=("parallel",),
                vmem_limit_bytes=vmem_limit),
        )(x_flat, w1t, b1r, w2t, b2r)
        return out_flat.reshape(N, C, H, W)

    # ---- two-pass path: (batch, HW-tile) grid -----------------------------
    # Pick an HW tile (multiple of 128, or the full extent) from the budget.
    per_lane_col = C * max(2 * itemsize + 8, 5 * itemsize)
    raw = (vmem_budget_bytes - weight_bytes - headroom) // per_lane_col
    hw_tile = max(128, int(raw // 128) * 128)
    if hw_tile >= HW:
        hw_tile = HW
    n_hw = pl.cdiv(HW, hw_tile)
    grid = (N, n_hw)
    vmem_limit = int(min(max(C * hw_tile * (4 * itemsize + 8)
                             + weight_bytes + 2 * headroom, 16 << 20),
                         limit_cap))
    cparams = pltpu.CompilerParams(
        dimension_semantics=("parallel", "arbitrary"),
        vmem_limit_bytes=vmem_limit)

    # Pass 1: per-(image, channel) sum & sum-of-squares over HW tiles.
    s1, s2 = pl.pallas_call(
        functools.partial(_cca_stats_kernel, hw=HW, hw_tile=hw_tile),
        out_shape=(jax.ShapeDtypeStruct((N, 1, C), jnp.float32),
                   jax.ShapeDtypeStruct((N, 1, C), jnp.float32)),
        grid_spec=pltpu.PrefetchScalarGridSpec(
            num_scalar_prefetch=0,
            grid=grid,
            in_specs=[pl.BlockSpec((1, C, hw_tile), lambda n, h: (n, 0, h))],
            out_specs=(pl.BlockSpec((1, 1, C), lambda n, h: (n, 0, 0)),
                       pl.BlockSpec((1, 1, C), lambda n, h: (n, 0, 0))),
        ),
        compiler_params=cparams,
    )(x_flat)

    # Pass 2: gate MLP once per image (first HW tile), then the apply sweep.
    out_flat = pl.pallas_call(
        functools.partial(_cca_apply_kernel, hw=HW),
        out_shape=jax.ShapeDtypeStruct((N, C, HW), x.dtype),
        grid_spec=pltpu.PrefetchScalarGridSpec(
            num_scalar_prefetch=0,
            grid=grid,
            in_specs=[
                pl.BlockSpec((1, 1, C), lambda n, h: (n, 0, 0)),
                pl.BlockSpec((1, 1, C), lambda n, h: (n, 0, 0)),
                pl.BlockSpec((C, Cr), lambda n, h: (0, 0)),
                pl.BlockSpec((1, Cr), lambda n, h: (0, 0)),
                pl.BlockSpec((Cr, C), lambda n, h: (0, 0)),
                pl.BlockSpec((1, C), lambda n, h: (0, 0)),
                pl.BlockSpec((1, C, hw_tile), lambda n, h: (n, 0, h)),
            ],
            out_specs=pl.BlockSpec((1, C, hw_tile), lambda n, h: (n, 0, h)),
            scratch_shapes=[pltpu.VMEM((1, C), jnp.float32)],
        ),
        compiler_params=cparams,
    )(s1, s2, w1t, b1r, w2t, b2r, x_flat)
    return out_flat.reshape(N, C, H, W)


# ---------------------------------------------------------------------------
# pure-JAX reference of CCALayer.forward
# ---------------------------------------------------------------------------
def _reference(x, w1, b1, w2, b2):
    mean = jnp.mean(x, axis=(2, 3), keepdims=True)
    var = jnp.mean((x - mean) ** 2, axis=(2, 3), keepdims=True)
    std = jnp.sqrt(var)
    y = (std + mean)[:, :, 0, 0]                              # (N, C)
    z = jnp.maximum(y @ w1.T + b1, 0.0)                       # (N, C//r)
    s = jax.nn.sigmoid(z @ w2.T + b2)                         # (N, C)
    return x * s[:, :, None, None]


if __name__ == "__main__":
    N, C, H, W = 2, 32, 16, 16
    reduction = 4
    Cr = C // reduction

    key = jax.random.PRNGKey(0)
    kx, k1, k2, k3, k4 = jax.random.split(key, 5)

    x = jax.random.normal(kx, (N, C, H, W), dtype=jnp.float32)
    w1 = jax.random.normal(k1, (Cr, C), dtype=jnp.float32) * 0.1
    b1 = jax.random.normal(k2, (Cr,), dtype=jnp.float32) * 0.1
    w2 = jax.random.normal(k3, (C, Cr), dtype=jnp.float32) * 0.1
    b2 = jax.random.normal(k4, (C,), dtype=jnp.float32) * 0.1

    ref = jax.block_until_ready(_reference(x, w1, b1, w2, b2))

    # fused (default) path
    out_fused = jax.block_until_ready(cca_layer(x, w1, b1, w2, b2))
    assert out_fused.shape == (N, C, H, W)
    assert jnp.allclose(out_fused, ref, atol=1e-5, rtol=1e-5), "fused mismatch"

    # two-pass (large-image) path, forced with a tiny budget so HW is tiled
    out_tiled = jax.block_until_ready(
        cca_layer(x, w1, b1, w2, b2, force_two_pass=True,
                  vmem_budget_bytes=(2 << 20) + (96 << 10)))
    assert out_tiled.shape == (N, C, H, W)
    assert jnp.allclose(out_tiled, ref, atol=1e-5, rtol=1e-5), "two-pass mismatch"

    print("KERNEL_OK")
</pallas_src>

<mosaic_0001>
module attributes {stable_mosaic.version = 11 : i64} {
  func.func @_cca_fused_kernel(%arg0: i32, %arg1: memref<1x32x256xf32, #tpu.memory_space<vmem>>, %arg2: memref<32x8xf32, #tpu.memory_space<vmem>>, %arg3: memref<1x8xf32, #tpu.memory_space<vmem>>, %arg4: memref<8x32xf32, #tpu.memory_space<vmem>>, %arg5: memref<1x32xf32, #tpu.memory_space<vmem>>, %arg6: memref<1x32x256xf32, #tpu.memory_space<vmem>>) attributes {dimension_semantics = [#tpu.dimension_semantics<parallel>], iteration_bounds = array<i64: 2>, scalar_prefetch = 0 : i64, scratch_operands = 0 : i64, tpu.core_type = #tpu.core_type<tc>, window_params = [{transform_indices = @transform_0, window_bounds = array<i64: 1, 32, 256>}, {pipeline_mode = #tpu.pipeline_mode<synchronous>, transform_indices = @transform_1, window_bounds = array<i64: 32, 8>}, {pipeline_mode = #tpu.pipeline_mode<synchronous>, transform_indices = @transform_2, window_bounds = array<i64: 1, 8>}, {pipeline_mode = #tpu.pipeline_mode<synchronous>, transform_indices = @transform_3, window_bounds = array<i64: 8, 32>}, {pipeline_mode = #tpu.pipeline_mode<synchronous>, transform_indices = @transform_4, window_bounds = array<i64: 1, 32>}, {transform_indices = @transform_5, window_bounds = array<i64: 1, 32, 256>}]} {
    %cst = arith.constant 0.000000e+00 : f32
    %0 = vector.broadcast %cst : f32 to vector<1x32xf32>
    %cst_0 = arith.constant 0.000000e+00 : f32
    %1 = vector.broadcast %cst_0 : f32 to vector<1x32xf32>
    %c0 = arith.constant 0 : index
    %c0_1 = arith.constant 0 : index
    %c0_2 = arith.constant 0 : index
    %2 = vector.load %arg1[%c0, %c0_1, %c0_2] : memref<1x32x256xf32, #tpu.memory_space<vmem>>, vector<1x32x256xf32>
    %cst_3 = arith.constant dense<0.000000e+00> : vector<1x32xf32>
    %3 = vector.multi_reduction <add>, %2, %cst_3 [2] : vector<1x32x256xf32> to vector<1x32xf32>
    %4 = arith.addf %0, %3 : vector<1x32xf32>
    %5 = arith.mulf %2, %2 : vector<1x32x256xf32>
    %cst_4 = arith.constant dense<0.000000e+00> : vector<1x32xf32>
    %6 = vector.multi_reduction <add>, %5, %cst_4 [2] : vector<1x32x256xf32> to vector<1x32xf32>
    %7 = arith.addf %1, %6 : vector<1x32xf32>
    %cst_5 = arith.constant 3.906250e-03 : f32
    %8 = vector.broadcast %cst_5 : f32 to vector<1x32xf32>
    %9 = arith.mulf %4, %8 : vector<1x32xf32>
    %cst_6 = arith.constant 3.906250e-03 : f32
    %10 = vector.broadcast %cst_6 : f32 to vector<1x32xf32>
    %11 = arith.mulf %7, %10 : vector<1x32xf32>
    %12 = arith.mulf %9, %9 : vector<1x32xf32>
    %13 = arith.subf %11, %12 : vector<1x32xf32>
    %cst_7 = arith.constant 0.000000e+00 : f32
    %14 = vector.broadcast %cst_7 : f32 to vector<1x32xf32>
    %15 = arith.maximumf %13, %14 : vector<1x32xf32>
    %16 = math.sqrt %15 : vector<1x32xf32>
    %17 = arith.addf %16, %9 : vector<1x32xf32>
    %c0_8 = arith.constant 0 : index
    %c0_9 = arith.constant 0 : index
    %18 = vector.load %arg2[%c0_8, %c0_9] : memref<32x8xf32, #tpu.memory_space<vmem>>, vector<32x8xf32>
    %cst_10 = arith.constant dense<0.000000e+00> : vector<1x8xf32>
    %19 = tpu.matmul %17, %18, %cst_10 {dimension_numbers = #tpu.dot_dimension_numbers<[1], [0], [0], [1], [0, 0, 1, 1], [], []>} : vector<1x32xf32>, vector<32x8xf32>, vector<1x8xf32> -> vector<1x8xf32>
    %c0_11 = arith.constant 0 : index
    %c0_12 = arith.constant 0 : index
    %20 = vector.load %arg3[%c0_11, %c0_12] : memref<1x8xf32, #tpu.memory_space<vmem>>, vector<1x8xf32>
    %21 = arith.addf %19, %20 : vector<1x8xf32>
    %cst_13 = arith.constant 0.000000e+00 : f32
    %22 = vector.broadcast %cst_13 : f32 to vector<1x8xf32>
    %23 = arith.maximumf %21, %22 : vector<1x8xf32>
    %c0_14 = arith.constant 0 : index
    %c0_15 = arith.constant 0 : index
    %24 = vector.load %arg4[%c0_14, %c0_15] : memref<8x32xf32, #tpu.memory_space<vmem>>, vector<8x32xf32>
    %cst_16 = arith.constant dense<0.000000e+00> : vector<1x32xf32>
    %25 = tpu.matmul %23, %24, %cst_16 {dimension_numbers = #tpu.dot_dimension_numbers<[1], [0], [0], [1], [0, 0, 1, 1], [], []>} : vector<1x8xf32>, vector<8x32xf32>, vector<1x32xf32> -> vector<1x32xf32>
    %c0_17 = arith.constant 0 : index
    %c0_18 = arith.constant 0 : index
    %26 = vector.load %arg5[%c0_17, %c0_18] : memref<1x32xf32, #tpu.memory_space<vmem>>, vector<1x32xf32>
    %27 = arith.addf %25, %26 : vector<1x32xf32>
    %28 = arith.negf %27 : vector<1x32xf32>
    %29 = math.exp %28 : vector<1x32xf32>
    %cst_19 = arith.constant 1.000000e+00 : f32
    %30 = vector.broadcast %cst_19 : f32 to vector<1x32xf32>
    %31 = arith.addf %30, %29 : vector<1x32xf32>
    %32 = arith.divf %30, %31 : vector<1x32xf32>
    %c0_20 = arith.constant 0 : index
    %c0_21 = arith.constant 0 : index
    %c0_22 = arith.constant 0 : index
    %33 = vector.load %arg1[%c0_20, %c0_21, %c0_22] : memref<1x32x256xf32, #tpu.memory_space<vmem>>, vector<1x32x256xf32>
    %34 = vector.shape_cast %32 : vector<1x32xf32> to vector<1x32x1xf32>
    %35 = vector.broadcast %34 : vector<1x32x1xf32> to vector<1x32x256xf32>
    %36 = arith.mulf %33, %35 : vector<1x32x256xf32>
    %c0_23 = arith.constant 0 : index
    %c0_24 = arith.constant 0 : index
    %c0_25 = arith.constant 0 : index
    %37 = vector.load %arg6[%c0_23, %c0_24, %c0_25] : memref<1x32x256xf32, #tpu.memory_space<vmem>>, vector<1x32x256xf32>
    tpu.vector_store %arg6[%c0_23, %c0_24, %c0_25], %36 {strides = array<i32>} : memref<1x32x256xf32, #tpu.memory_space<vmem>>, vector<1x32x256xf32>,
    return
  }
  func.func @transform_0(%arg0: i32) -> (i32, i32, i32) {
    %c0_i32 = arith.constant 0 : i32
    %c0_i32_0 = arith.constant 0 : i32
    %c0_i32_1 = arith.constant 0 : i32
    return %arg0, %c0_i32, %c0_i32_0 : i32, i32, i32
  }
  func.func @transform_1(%arg0: i32) -> (i32, i32) {
    %c0_i32 = arith.constant 0 : i32
    %c0_i32_0 = arith.constant 0 : i32
    %c0_i32_1 = arith.constant 0 : i32
    return %c0_i32, %c0_i32_0 : i32, i32
  }
  func.func @transform_2(%arg0: i32) -> (i32, i32) {
    %c0_i32 = arith.constant 0 : i32
    %c0_i32_0 = arith.constant 0 : i32
    %c0_i32_1 = arith.constant 0 : i32
    return %c0_i32, %c0_i32_0 : i32, i32
  }
  func.func @transform_3(%arg0: i32) -> (i32, i32) {
    %c0_i32 = arith.constant 0 : i32
    %c0_i32_0 = arith.constant 0 : i32
    %c0_i32_1 = arith.constant 0 : i32
    return %c0_i32, %c0_i32_0 : i32, i32
  }
  func.func @transform_4(%arg0: i32) -> (i32, i32) {
    %c0_i32 = arith.constant 0 : i32
    %c0_i32_0 = arith.constant 0 : i32
    %c0_i32_1 = arith.constant 0 : i32
    return %c0_i32, %c0_i32_0 : i32, i32
  }
  func.func @transform_5(%arg0: i32) -> (i32, i32, i32) {
    %c0_i32 = arith.constant 0 : i32
    %c0_i32_0 = arith.constant 0 : i32
    %c0_i32_1 = arith.constant 0 : i32
    return %arg0, %c0_i32, %c0_i32_0 : i32, i32, i32
  }
}

</mosaic_0001>

<bundles_post_ra>
// kernel: tpu_custom_call.1
= control target key start
LH: loop header
LB: loop body
LE: loop exit
PB: predicated region body
PF: predicated region fallthrough
CT: control target
= control target key end

     0   :  { %10 = vsyncpa [#allocation3], 0  ;;  %s1159_s0 = inlined_call_operand.hbm [shape: f32[2,32,256], index: 0, kind: input, shape index: {}]   ;;  %s1160_s1 = inlined_call_operand.vmem [shape: f32[32,8], index: 1, kind: input, shape index: {}]   ;;  %s1161_s2 = inlined_call_operand.vmem [shape: f32[1,8], index: 2, kind: input, shape index: {}]   ;;  %s1162_s3 = inlined_call_operand.vmem [shape: f32[8,32], index: 3, kind: input, shape index: {}]   ;;  %s1163_s4 = inlined_call_operand.vmem [shape: f32[1,32], index: 4, kind: input, shape index: {}]   ;;  %s1164_s5 = inlined_call_operand.hbm [shape: f32[2,32,256], index: 5, kind: output, shape index: {}]  }
   0x1   :  { %12 = vsyncpa [#allocation3 + $0x1], 0 }
   0x2   :  { %13 = vsyncpa [#allocation4], 0 }
   0x3   :  { %15 = vsyncpa [#allocation4 + $0x1], 0  ;;  %s907_s18 = smov 0   ;;  %s909_s19 = smov 0  }
   0x4   :  { %s911_s20 = smov 0   ;;  %s913_s21 = smov 0  }
   0x5 LB: > { %s928_s22 = sadd.s32 4294967295, %s866_s21   ;;  %s657_s23 = sadd.s32 4294967294, %s866_s21   ;;  %s866_s21 = sphi %s913_s21, %s1177_s21   ;;  %s862_s20 = sphi %s911_s20, %s1176_s20   ;;  %s858_s19 = sphi %s909_s19, %s1175_s19   ;;  %s854_s18 = sphi %s907_s18, %s1174_s18  }
   0x6   : > { %s932_s24 = sadd.s32 1, %s866_s21   ;;  %s28_s25 = sadd.s32 1, %s862_s20 }
   0x7   : > { %s25_s26 = ssub.s32 %s866_s21, %s932_s24  ;;  %p35_p0 = scmp.ne.s32.totalorder %s862_s20, %s858_s19 }
   0x8   : > { %p26_p1 = scmp.eq.s32.totalorder %s25_s26, 0  ;;  %p36_p2 = scmp.eq.s32.totalorder %s866_s21, 0 }
   0x9   : > { %p41_p3 = scmp.ne.s32.totalorder %s858_s19, %s854_s18  ;;  %p42_p4 = scmp.eq.s32.totalorder %s928_s22, 0 }
   0xa   : > { %s944_s27 = scalar_select %p26_p1, %s862_s20, %s28_s25  }
   0xb   : > { %p946_p5 = por %p36_p2, %p35_p0  ;;  %p950_p6 = por %p42_p4, %p41_p3 }
   0xc   : > { %p149_p7 = scmp.eq.s32.totalorder %s928_s22, 1  ;;  %p155_p8 = scmp.eq.s32.totalorder %s657_s23, 1 }
   0xd   : > { %p717_p10 = scmp.lt.s32.totalorder %s866_s21, 2  ;;  %s187_s7 = sand.u32 1, %s862_s20  }
   0xe   : > { %p957_p11 = por %p149_p7, %p35_p0  ;;  %p961_p12 = por %p155_p8, %p41_p3 }
   0xf   : > { %s674_s8 = sshll.u32 %s866_s21, 10  ;;  %s660_s9 = sshll.u32 %s187_s7, 6 }
  0x10   : > { %s1168_s30 = scalar_select %p957_p11, 1, 0 }
  0x11   : > { %s1169_s6 = scalar_select %p961_p12, 1, 0 }
  0x12   : > { %s970_s12 = scalar_lea.hbm %s1159_s0, %s674_s8  ;;  %s191_s13 = scalar_lea.vmem [#allocation2], %s660_s9 }
  0x13   : > { %s198_s14 = sshll.u32 %s191_s13, 4  ;;  %p974_p13 = pnand %p717_p10, %p946_p5  ;;  %s978_s14 = int_to_ptr.vmem [resolvable:$true] %s198_s14 }
  0x14   : > { %s980_s16 = scalar_lea.sflag [#allocation3], %s187_s7  ;;  %s770_s17 = scalar_lea.hbm %s970_s12, 1024 }
  0x15   : > { %p771_p0 = scmp.ne.s32.totalorder %s970_s12, %s770_s17  ;;  %p772_p1 = pneg %p974_p13 }
  0x16   : > { %s775_s26 = scalar_lea.hbm %s1159_s0, 2048  ;;  %p776_p4 = scmp.lt.u32.totalorder %s970_s12, %s1159_s0 }
  0x17   : > { %p773_p2 = pnand %p772_p1, %p771_p0  ;;  %p777_p5 = scmp.lt.u32.totalorder %s775_s26, %s770_s17 }
  0x18   : > { %p779_p8 = scmp.lt.u32.totalorder %s770_s17, %s970_s12 }
  0x19   : > { %p774_p3 = pneg %p773_p2  ;;  %p778_p7 = por %p777_p5, %p776_p4 }
  0x1b   : > { %p780_p10 = por %p779_p8, %p778_p7 }
  0x1d   : > { %p781_p9 = pnand %p780_p10, %p774_p3 }
  0x1f   : > { %784 = shalt.err (!%p781_p9)
}
  0x20   : > { %s785_s7 = scalar_lea.vmem %s978_s14, 1024  ;;  %s868_s9 = smov [#allocation2]  }
  0x21   : > { %p786_p0 = scmp.ne.s32.totalorder %s978_s14, %s785_s7  ;;  %s790_s10 = sshll.u32 %s868_s9, 4  ;;  %s791_s10 = int_to_ptr.vmem [resolvable:$false] %s790_s10 }
  0x22   : > { %s792_s11 = scalar_lea.vmem %s791_s10, 2048  ;;  %p793_p11 = scmp.lt.s32.totalorder %s978_s14, %s791_s10 }
  0x23   : > { %p788_p2 = pnand %p786_p0, %p772_p1  ;;  %p794_p4 = scmp.lt.s32.totalorder %s792_s11, %s785_s7 }
  0x25   : > { %p789_p12 = pneg %p788_p2  ;;  %p795_p5 = por %p794_p4, %p793_p11 }
  0x27   : > { %p796_p7 = pnand %p795_p5, %p789_p12 }
  0x29   : > { %799 = shalt.err (!%p796_p7)
}
  0x2a   : > { %s869_s13 = smov 256   ;;  %s870_s17 = smov 16  }
  0x2b   : > { %712 = dma.hbm_to_vmem [thread:$0]  (!%p974_p13), %s970_s12, 1024, %s978_s14, %s980_s16, %s869_s13, %s869_s13, %s870_s17  }
  0x2c   : > { %p663_p9 = scmp.ge.s32.totalorder %s866_s21, 1  ;;  %p206_p1 = scmp.lt.s32.totalorder %s866_s21, 3 }
  0x2e   : > { %p207_p3 = pnand %p663_p9, %p206_p1 }
  0x2f   : > { %s1011_s23 = sand.u32 (!%p207_p3), 1, %s858_s19  }
  0x30   : > { %210 = sbr.rel (%p207_p3) target bundleno = 839 (0x347), region = 40  ;;  %s664_s25 = sshll.u32 (!%p207_p3), %s1011_s23, 6 }
  0x31   : > { %s213_s26 = scalar_lea.sflag (!%p207_p3), [#allocation3], %s1011_s23  ;;  %s216_s28 = scalar_lea.vmem (!%p207_p3), [#allocation2], %s664_s25 }
  0x37   : > { %845 = dma.done.wait (%p950_p6), %s213_s26, 1024  }
  0x38   : > { %847 = vsyncadd (%p950_p6), %s213_s26, 4294966272  ;;  %v1021_v0 = vld [vmem:[%s216_s28 + $0x20] sm:$0xff]  ;;  %v1023_v1 = vld [vmem:[%s216_s28 + $0x28] sm:$0xff]  ;;  %v871_v27 = vmov 0.0|0.0   ;;  %vm872_vm0 = vmmov 0   ;;  %v873_v30 = vmov 0.0   ;;  %v352_v57 = vlaneseq }
  0x39   : > { %v1025_v2 = vld [vmem:[%s216_s28] sm:$0xff]  ;;  %v257_v3 = vadd.f32 %v1023_v1, %v1021_v0  ;;  %v1029_v4 = vld [vmem:[%s216_s28 + $0x8] sm:$0xff]  ;;  %v1031_v5 = vld [vmem:[%s216_s28 + $0x30] sm:$0xff]  ;;  %v271_v20 = vmul.f32 %v1021_v0, %v1021_v0  ;;  %v272_v21 = vmul.f32 %v1023_v1, %v1023_v1  ;;  %699 = vmatprep.subr.bf16.mxu0 %v871_v27  ;;  %691 = vmatprep.mubr.msk.f32.mxu0 %vm872_vm0, %v873_v30  ;;  %vm363_vm9 = vcmask 130112   ;;  %s242_s29 = scalar_lea.vmem [#allocation5], %s664_s25  ;;  %s675_s14 = sshll.u32 %s928_s22, 10 }
  0x3a   : > { %v1033_v6 = vld [vmem:[%s216_s28 + $0x38] sm:$0xff]  ;;  %v251_v7 = vadd.f32 %v1029_v4, %v1025_v2  ;;  %v1037_v8 = vld [vmem:[%s216_s28 + $0x10] sm:$0xff]  ;;  %v267_v14 = vmul.f32 %v1025_v2, %v1025_v2  ;;  %v268_v15 = vmul.f32 %v1029_v4, %v1029_v4  ;;  %v273_v17 = vmul.f32 %v1031_v5, %v1031_v5  ;;  %v343_v24 = vld [vmem:[%s1160_s1] sm:$0xff]  ;;  %694 = vmatprep.subr.mxu1 %v873_v30  ;;  %s584_s12 = sshll.u32 %s242_s29, 4  ;;  %s1113_s16 = scalar_lea.hbm %s1164_s5, %s675_s14  ;;  %s1108_s12 = int_to_ptr.vmem [resolvable:$true] %s584_s12 }
  0x3b   : > { %v1039_v9 = vld [vmem:[%s216_s28 + $0x18] sm:$0xff]  ;;  %258 = vadd.xlane.f32.xlu1 %v257_v3  ;;  %v260_v10 = vadd.f32 %v1033_v6, %v1031_v5  ;;  %v269_v11 = vmul.f32 %v1037_v8, %v1037_v8  ;;  %v274_v18 = vmul.f32 %v1033_v6, %v1033_v6  ;;  %v281_v23 = vadd.f32 %v272_v21, %v271_v20  ;;  %v344_v25 = vld [vmem:[%s1160_s1 + $0x8] sm:$0xff]  ;;  %v345_v26 = vld [vmem:[%s1160_s1 + $0x10] sm:$0xff]  ;;  %s571_s22 = scalar_lea.sflag [#allocation4], %s1011_s23  ;;  %s800_s8 = scalar_lea.vmem %s1108_s12, 1024 }
  0x3c   : > { %v270_v12 = vmul.f32 %v1039_v9, %v1039_v9  ;;  %252 = vadd.xlane.f32.xlu0 %v251_v7  ;;  %v254_v13 = vadd.f32 %v1039_v9, %v1037_v8  ;;  %v275_v19 = vadd.f32 %v268_v15, %v267_v14  ;;  %v700_v28 = vpack.c.bf16 %v344_v25, %v343_v24  ;;  %v346_v29 = vld [vmem:[%s1160_s1 + $0x18] sm:$0xff]  ;;  %p801_p6 = scmp.ne.s32.totalorder %s1108_s12, %s800_s8  ;;  %p1171_p11 = scmp.ne.s32.totalorder %s1168_s30, 0 }
  0x3d   : > { %v284_v22 = vadd.f32 %v274_v18, %v273_v17  ;;  %696 = vmatprep.mubr.msk.f32.mxu1 %vm872_vm0, %v873_v30  ;;  %v703_v31 = vpack.c.bf16 %v346_v29, %v345_v26  ;;  %v353_v61 = vand.u32 127, %v352_v57  ;;  %v1081_v62 = vshrl.u32 %v352_v57, 7  ;;  %s874_s7 = smov [#allocation5]  }
  0x3e   : > { %v278_v16 = vadd.f32 %v270_v12, %v269_v11  ;;  %701 = vmatpush3.bf16.msra.mxu0 %v700_v28  ;;  %vm370_vm10 = vcmask 195712   ;;  %vm377_vm11 = vcmask 261312   ;;  %vm379_vm12 = vcmask 261120   ;;  %p802_p12 = pnand %p801_p6, %p1171_p11  ;;  %s804_s9 = sshll.u32 %s874_s7, 4  ;;  %s805_s9 = int_to_ptr.vmem [resolvable:$false] %s804_s9 }
  0x3f   : > { %261 = vadd.xlane.f32.xlu1 %v260_v10  ;;  %702 = vmatprep.subr.bf16.mxu0 %v871_v27  ;;  %v358_v63 = vadd.s32 4294967288, %v353_v61  ;;  %v356_v11 = vsub.s32 %v353_v61, %v1081_v62  ;;  %v372_v12 = vadd.s32 4294967272, %v353_v61  ;;  %v365_v21 = vadd.s32 4294967280, %v353_v61  ;;  %s806_s10 = scalar_lea.vmem %s805_s9, 2048  ;;  %p807_p8 = scmp.lt.s32.totalorder %s1108_s12, %s805_s9 }
  0x40   : > { %255 = vadd.xlane.f32.xlu0 %v254_v13  ;;  %vm455_vm13 = vcmask 64512   ;;  %p803_p13 = pneg %p802_p12  ;;  %p808_p10 = scmp.lt.s32.totalorder %s806_s10, %s800_s8 }
  0x41   : > { %v361_v15 = vsub.s32 %v358_v63, %v1081_v62  ;;  %v375_v26 = vsub.s32 %v372_v12, %v1081_v62 }
  0x42   : > { %704 = vmatpush3.bf16.msra.mxu0 %v703_v31  ;;  %p809_p0 = por %p808_p10, %p807_p8 }
  0x43   : > { %279 = vadd.xlane.f32.xlu1 %v278_v16 }
  0x44   : > { %276 = vadd.xlane.f32.xlu0 %v275_v19  ;;  %p810_p2 = pnand %p809_p0, %p803_p13 }
  0x47   : > { %285 = vadd.xlane.f32.xlu1 %v284_v22 }
  0x48   : > { %282 = vadd.xlane.f32.xlu0 %v281_v23 }
  0xc8   : > { %v259_v32 = vpop.xlane.xlu1 %258 }
  0xc9   : > { %v253_v33 = vpop.xlane.xlu0 %252  ;;  %v1075_v43 = vmul.f32 0.00390625, %v259_v32 }
  0xca   : > { %v291_v36 = vmul.f32 0.00390625, %v253_v33 }
  0xcb   : > { %v301_v53 = vmul.f32 %v1075_v43, %v1075_v43 }
  0xcc   : > { %v262_v34 = vpop.xlane.xlu1 %261  ;;  %v299_v44 = vmul.f32 %v291_v36, %v291_v36 }
  0xcd   : > { %v256_v35 = vpop.xlane.xlu0 %255  ;;  %v1073_v39 = vmul.f32 0.00390625, %v262_v34  ;;  %v368_v34 = vsub.s32 %v365_v21, %v1081_v62 }
  0xce   : > { %v292_v37 = vmul.f32 0.00390625, %v256_v35 }
  0xcf   : > { %v302_v49 = vmul.f32 %v1073_v39, %v1073_v39 }
  0xd0   : > { %v280_v38 = vpop.xlane.xlu1 %279  ;;  %v300_v40 = vmul.f32 %v292_v37, %v292_v37 }
  0xd1   : > { %v296_v41 = vmul.f32 0.00390625, %v280_v38  ;;  %v277_v42 = vpop.xlane.xlu0 %276 }
  0xd2   : > { %v295_v45 = vmul.f32 0.00390625, %v277_v42 }
  0xd3   : > { %v304_v46 = vsub.f32 %v296_v41, %v300_v40 }
  0xd4   : > { %v303_v47 = vsub.f32 %v295_v45, %v299_v44  ;;  %v286_v48 = vpop.xlane.xlu1 %285 }
  0xd5   : > { %v308_v50 = vmax.f32 %v304_v46, 0.0  ;;  %v298_v51 = vmul.f32 0.00390625, %v286_v48  ;;  %v283_v52 = vpop.xlane.xlu0 %282 }
  0xd6   : > { %v307_v54 = vmax.f32 %v303_v47, 0.0  ;;  %v297_v55 = vmul.f32 0.00390625, %v283_v52  ;;  %v453_v47 = vld [vmem:[%s1162_s3] sm:$0xff] }
  0xd7   : > { %758 = vrsqrt.f32 %v308_v50  ;;  %v306_v56 = vsub.f32 %v298_v51, %v302_v49  ;;  %vm320_vm1 = vcmp.eq.f32.partialorder %v308_v50, inf  ;;  %v323_v14 = vand.u32 2147483648, %v308_v50  ;;  %695 = vmatpush3.msra.mxu1 %v453_v47  ;;  %v454_v51 = vld [vmem:[%s1163_s4] sm:$0x1] }
  0xd8   : > { %760 = vrsqrt.f32 %v307_v54  ;;  %v305_v58 = vsub.f32 %v297_v55, %v301_v53  ;;  %vm313_vm2 = vcmp.eq.f32.partialorder %v307_v54, inf  ;;  %v316_v16 = vand.u32 2147483648, %v307_v54 }
  0xd9   : > { %v310_v59 = vmax.f32 %v306_v56, 0.0  ;;  %vm322_vm3 = vcmp.eq.f32.partialorder %v308_v50, 0.0  ;;  %vm315_vm4 = vcmp.eq.f32.partialorder %v307_v54, 0.0 }
  0xda   : > { %v309_v60 = vmax.f32 %v305_v58, 0.0  ;;  %v537_v58 = vsub.s32 0, %v1081_v62 }
  0xdb   : > { %762 = vrsqrt.f32 %v310_v59  ;;  %vm334_vm5 = vcmp.eq.f32.partialorder %v310_v59, inf  ;;  %v337_v28 = vand.u32 2147483648, %v310_v59  ;;  %vm336_vm7 = vcmp.eq.f32.partialorder %v310_v59, 0.0 }
  0xdc   : > { %764 = vrsqrt.f32 %v309_v60  ;;  %vm327_vm6 = vcmp.eq.f32.partialorder %v309_v60, inf  ;;  %v330_v30 = vand.u32 2147483648, %v309_v60  ;;  %vm329_vm8 = vcmp.eq.f32.partialorder %v309_v60, 0.0 }
  0xe1   : > { %v759_v3 = vpop.eup %758 }
  0xe2   : > { %v761_v7 = vpop.eup %760  ;;  %v319_v10 = vmul.f32 %v759_v3, %v308_v50 }
  0xe3   : > { %v312_v13 = vmul.f32 %v761_v7, %v307_v54 }
  0xe4   : > { %v321_v17 = vsel %vm320_vm1, %v308_v50, %v319_v10 }
  0xe5   : > { %v763_v18 = vpop.eup %762  ;;  %v314_v19 = vsel %vm313_vm2, %v307_v54, %v312_v13  ;;  %v324_v20 = vsel %vm322_vm3, %v323_v14, %v321_v17 }
  0xe6   : > { %v765_v22 = vpop.eup %764  ;;  %v317_v23 = vsel %vm315_vm4, %v316_v16, %v314_v19  ;;  %v333_v24 = vmul.f32 %v763_v18, %v310_v59  ;;  %v340_v25 = vadd.f32 %v324_v20, %v292_v37 }
  0xe7   : > { %v326_v27 = vmul.f32 %v765_v22, %v309_v60  ;;  %v339_v29 = vadd.f32 %v317_v23, %v291_v36 }
  0xe8   : > { %v335_v31 = vsel %vm334_vm5, %v310_v59, %v333_v24  ;;  %v362_v37 = vrot.slane %v340_v25, %v361_v15 }
  0xe9   : > { %v328_v32 = vsel %vm327_vm6, %v309_v60, %v326_v27  ;;  %v338_v33 = vsel %vm336_vm7, %v337_v28, %v335_v31  ;;  %v357_v40 = vrot.slane %v339_v29, %v356_v11 }
  0xea   : > { %v331_v35 = vsel %vm329_vm8, %v330_v30, %v328_v32  ;;  %v342_v38 = vadd.f32 %v338_v33, %v1073_v39  ;;  %v347_v39 = vld [vmem:[%s1161_s2] sm:$0x1] }
  0xeb   : > { %v341_v41 = vadd.f32 %v331_v35, %v1075_v43  ;;  %v364_v44 = vsel %vm363_vm9, %v362_v37, %v357_v40 }
  0xec   : > { %v376_v42 = vrot.slane %v342_v38, %v375_v26 }
  0xed   : > { %v369_v36 = vrot.slane %v341_v41, %v368_v34 }
  0xef   : > { %v371_v45 = vsel %vm370_vm10, %v369_v36, %v364_v44 }
  0xf0   : > { %v378_v46 = vsel %vm377_vm11, %v376_v42, %v371_v45 }
  0xf1   : > { %692 = vmatmul.mubr.msk.f32.vlgmr.msra.gmra.mrb[0].mxu0 %vm379_vm12, %v378_v46 }
 0x1c4   : > { %v448_v43 = vpop.f32.mrb[0].mxu0 }
 0x1c5   : > { %v449_v48 = vadd.f32 %v448_v43, %v347_v39  ;;  %v693_v49 = vpop.f32.mrb[1].mxu0 }
 0x1c7   : > { %v452_v50 = vmax.f32 %v449_v48, 0.0 }
 0x1c9   : > { %697 = vmatmul.mubr.msk.f32.vlgmr.msra.gmra.mrb[0].mxu1 %vm455_vm13, %v452_v50 }
 0x29c   : > { %v525_v52 = vpop.f32.mrb[0].mxu1 }
 0x29d   : > { %v526_v53 = vadd.f32 %v525_v52, %v454_v51  ;;  %v698_v54 = vpop.f32.mrb[1].mxu1 }
 0x29f   : > { %v668_v55 = vmul.f32 -1.442695, %v526_v53 }
 0x2a1   : > { %766 = vpow2.f32 %v668_v55 }
 0x2ab   : > { %v767_v56 = vpop.eup %766 }
 0x2ac   : > { %v532_v57 = vadd.f32 1.0, %v767_v56 }
 0x2ae   : > { %768 = vrcp.f32 %v532_v57 }
 0x2b8   : > { %v769_v59 = vpop.eup %768 }
 0x2b9   : > { %v538_v60 = vrot.slane %v769_v59, %v537_v58 }
 0x2bb   : > { %544 = vbcast.lane.b32.xlu1 %v538_v60, 264  ;;  %540 = vbcast.lane.b32.xlu0 %v538_v60, 256 }
 0x2bf   : > { %548 = vbcast.lane.b32.xlu1 %v538_v60, 272 }
 0x2c3   : > { %552 = vbcast.lane.b32.xlu1 %v538_v60, 280 }
 0x32d   : > { %v545_v61 = vpop.permute.xlu1 %544  ;;  %v541_v63 = vpop.permute.xlu0 %540 }
 0x32e   : > { %v556_v3 = vmul.f32 %v545_v61, %v1037_v8  ;;  %v557_v7 = vmul.f32 %v545_v61, %v1039_v9  ;;  %v554_v10 = vmul.f32 %v541_v63, %v1025_v2  ;;  %v555_v11 = vmul.f32 %v541_v63, %v1029_v4 }
 0x330   : > { %564 = vst [vmem:[%s242_s29 + $0x10] sm:$0xff] %v556_v3  ;;  %565 = vst [vmem:[%s242_s29 + $0x18] sm:$0xff] %v557_v7 }
 0x331   : > { %562 = vst [vmem:[%s242_s29] sm:$0xff] %v554_v10  ;;  %563 = vst [vmem:[%s242_s29 + $0x8] sm:$0xff] %v555_v11  ;;  %v549_v62 = vpop.permute.xlu1 %548 }
 0x332   : > { %v558_v12 = vmul.f32 %v549_v62, %v1021_v0  ;;  %v559_v8 = vmul.f32 %v549_v62, %v1023_v1 }
 0x334   : > { %566 = vst [vmem:[%s242_s29 + $0x20] sm:$0xff] %v558_v12  ;;  %567 = vst [vmem:[%s242_s29 + $0x28] sm:$0xff] %v559_v8 }
 0x335   : > { %v553_v2 = vpop.permute.xlu1 %552 }
 0x336   : > { %v560_v4 = vmul.f32 %v553_v2, %v1031_v5  ;;  %v561_v0 = vmul.f32 %v553_v2, %v1033_v6 }
 0x338   : > { %568 = vst [vmem:[%s242_s29 + $0x30] sm:$0xff] %v560_v4  ;;  %569 = vst [vmem:[%s242_s29 + $0x38] sm:$0xff] %v561_v0 }
 0x339   : > { %813 = shalt.err (!%p810_p2)
}
 0x33a   : > { %s814_s11 = scalar_lea.hbm %s1113_s16, 1024  ;;  %s818_s26 = scalar_lea.hbm %s1164_s5, 2048 }
 0x33b   : > { %p815_p4 = scmp.ne.s32.totalorder %s1113_s16, %s814_s11  ;;  %p819_p9 = scmp.lt.u32.totalorder %s1113_s16, %s1164_s5 }
 0x33c   : > { %p820_p1 = scmp.lt.u32.totalorder %s818_s26, %s814_s11  ;;  %p822_p6 = scmp.lt.u32.totalorder %s814_s11, %s1113_s16 }
 0x33d   : > { %p816_p5 = pnand %p815_p4, %p1171_p11 }
 0x33e   : > { %p821_p3 = por %p820_p1, %p819_p9 }
 0x33f   : > { %p817_p7 = pneg %p816_p5 }
 0x340   : > { %p823_p12 = por %p822_p6, %p821_p3 }
 0x342   : > { %p824_p13 = pnand %p823_p12, %p817_p7 }
 0x344   : > { %827 = shalt.err (!%p824_p13)
}
 0x345   : > { %s875_s14 = smov 256   ;;  %s876_s25 = smov 16  }
 0x346   : > { %707 = dma.vmem_to_hbm [thread:$0]  (%p1171_p11), %s1108_s12, 1024, %s1113_s16, %s571_s22, %s875_s14, %s875_s14, %s876_s25  }
 0x347 PF: > { %s599_s15 = sand.u32 1, %s854_s18   ;;  %p1172_p8 = scmp.ne.s32.totalorder %s1169_s6, 0 }
 0x348   : > { %p1173_p10 = scmp.ge.s32.totalorder %s866_s21, 2  ;;  %s600_s8 = scalar_lea.sflag [#allocation4], %s599_s15 }
 0x34a   : > { %p714_p0 = pnand %p1173_p10, %p1172_p8 }
 0x34c   : > { %849 = dma.done.wait (!%p714_p0), %s600_s8, 1024  }
 0x34d   : > { %851 = vsyncadd (!%p714_p0), %s600_s8, 4294966272  ;;  %p18_p2 = scmp.ge.s32.totalorder %s932_s24, 4   ;;  %s1174_s18 = smov %s858_s19 }
 0x34e   : > { %s1175_s19 = smov %s862_s20  ;;  %s1176_s20 = smov %s944_s27 }
 0x34f   : > { %s1177_s21 = smov %s932_s24  ;;  %20 = sbr.rel (!%p18_p2) target bundleno = 5 (0x5), region = 85 }
 0x356   :  { %605 = vsyncpa [#allocation3], 1 }
 0x357   :  { %607 = vsyncpa [#allocation3 + $0x1], 1 }
 0x358   :  { %608 = vsyncpa [#allocation4], 1 }
 0x359   :  { %610 = vsyncpa [#allocation4 + $0x1], 1 }

</bundles_post_ra>
